<compile_context>
chip_gen: v7x
topology: tpu7x:2x2x1
jax: 0.10.0
libtpu: 0.0.40
codegen_flags: <defaults>
</compile_context>

<pallas_src>
import functools

import jax
import jax.numpy as jnp
from jax import lax
from jax.experimental import pallas as pl
from jax.experimental.pallas import tpu as pltpu


def _round_up(x, m):
    return ((x + m - 1) // m) * m


def _classifier_kernel(feat_ref, w_ref, b_ref, labels_ref, out_ref,
                       *, n_rows, tile_n, num_class, lanes):
    pid = pl.program_id(0)
    C = num_class
    L = lanes

    feat = feat_ref[...]                               # [TN, D], native dtype (f32 / bf16)
    w = w_ref[...]                                     # [D, C], resident, same dtype as feat
    b = b_ref[...].astype(jnp.float32)                 # [1, C]
    labels = labels_ref[...]                           # [TN, 1] int32

    # fc_512: logits = x @ W^T + b.  Weight is pre-transposed to [D, C], so the MXU
    # contracts (1,)x(0,) with no per-step transpose; accumulation in f32.
    logits = lax.dot_general(
        feat, w, dimension_numbers=(((1,), (0,)), ((), ())),
        preferred_element_type=jnp.float32) + b        # [TN, C] f32
    TN = logits.shape[0]

    # Row mask for the ragged last tile (no wrapper padding -> OOB rows hold garbage).
    row = lax.broadcasted_iota(jnp.int32, (TN, 1), 0)
    real = (pid * tile_n + row) < n_rows               # [TN, 1] bool
    valid = (labels >= 0) & real                       # ignore_index=-1 and padding rows

    col_c = lax.broadcasted_iota(jnp.int32, (TN, C), 1)
    # PyTorch negative index -1 wraps to C-1 in the category_accuracy path.
    adj_labels = jnp.where(labels < 0, labels + C, labels)   # [TN, 1]

    # Numerically-stable cross entropy; invalid/garbage rows are zeroed via jnp.where
    # (NaN-safe: a NaN in a masked-off row cannot reach the sums).
    m = jnp.max(logits, axis=1, keepdims=True)                               # [TN, 1]
    lse = m + jnp.log(jnp.sum(jnp.exp(logits - m), axis=1, keepdims=True))   # [TN, 1]
    logit_at_label = jnp.sum(jnp.where(col_c == adj_labels, logits, 0.0),
                             axis=1, keepdims=True)                          # [TN, 1]
    per_row_loss = jnp.where(valid, lse - logit_at_label, 0.0)               # [TN, 1]

    # torch.max(pred, dim=1): index of the FIRST maximum.
    is_max = logits == m
    preds = jnp.min(jnp.where(is_max, col_c, C), axis=1, keepdims=True)      # [TN, 1] int32
    match = preds == labels        # original labels: never true for label=-1 rows

    loss_sum = jnp.sum(per_row_loss)
    n_valid = jnp.sum(jnp.where(valid, 1.0, 0.0))
    acc_sum = jnp.sum(jnp.where(valid & match, 1.0, 0.0))

    # Per-class counts, computed directly on the lane-padded width L (extra lanes stay 0).
    col_l = lax.broadcasted_iota(jnp.int32, (TN, L), 1)
    onehot_real = ((col_l == adj_labels) & real).astype(jnp.float32)         # [TN, L]
    row_total = jnp.sum(onehot_real, axis=0, keepdims=True)                  # [1, L]
    row_correct = jnp.sum(jnp.where(match, onehot_real, 0.0),
                          axis=0, keepdims=True)                             # [1, L]

    lane_ids = lax.broadcasted_iota(jnp.int32, (1, L), 1)
    scalars_row = (jnp.where(lane_ids == 0, loss_sum, 0.0)
                   + jnp.where(lane_ids == 1, n_valid, 0.0)
                   + jnp.where(lane_ids == 2, acc_sum, 0.0))                 # [1, L]

    # Single lane-dense per-tile output block: [correct; total; scalars].
    sub = lax.broadcasted_iota(jnp.int32, (3, L), 0)
    block = jnp.where(sub == 0, row_correct,
                      jnp.where(sub == 1, row_total, scalars_row))           # [3, L]
    out_ref[...] = block.reshape(1, 3, L)


def classifier_forward(feature, weight, bias, labels, *, tile_n=512):
    """feature [N, D] (f32/bf16), weight [C, D], bias [C], labels [N] int -> (loss, acc, [2, C])."""
    N, D = feature.shape
    C = weight.shape[0]
    L = max(128, _round_up(C, 128))

    # Generation-aware VMEM budget (v5e/v6e: 128 MiB per core, v7x: 64 MiB per TC).
    try:
        vmem_cap = int(pltpu.get_tpu_info().vmem_capacity_bytes)
    except Exception:
        vmem_cap = 64 << 20          # conservative (v7x) fallback

    itemsize = jnp.dtype(feature.dtype).itemsize
    feat_budget = int(0.4 * vmem_cap)            # double-buffered feature stream budget
    max_tn = max(8, ((feat_budget // (2 * D * itemsize)) // 8) * 8)
    TN = max(8, min(_round_up(N, 8), tile_n, max_tn))
    num_tiles = pl.cdiv(N, TN)                   # ragged last tile handled in-kernel
    # TODO(synk): for huge D where even TN=8 overflows VMEM, add a second "arbitrary"
    # grid axis over D with a VMEM logits accumulator and pl.when init/finalize.

    weight_t = weight.T.astype(feature.dtype)    # [D, C] one-time tiny copy, MXU-ready
    bias2d = bias.reshape(1, C).astype(jnp.float32)
    labels2d = labels.astype(jnp.int32).reshape(N, 1)

    # Tight VMEM budget: feature + labels streams double-buffered, resident (but
    # double-allocated) weight/bias, live [TN, L] temporaries, output block, slack.
    budget = (2 * TN * D * itemsize
              + 2 * TN * 128 * 4
              + 2 * D * L * itemsize
              + 4 * 8 * L * 4
              + 8 * TN * L * 4
              + (2 << 20))
    vmem_limit = int(min(max(budget, 16 << 20), int(0.75 * vmem_cap)))

    kernel = functools.partial(_classifier_kernel, n_rows=N, tile_n=TN,
                               num_class=C, lanes=L)

    part = pl.pallas_call(
        kernel,
        grid=(num_tiles,),
        in_specs=[
            pl.BlockSpec((TN, D), lambda i: (i, 0)),     # feature: streamed / pipelined
            pl.BlockSpec((D, C), lambda i: (0, 0)),      # weight: resident
            pl.BlockSpec((1, C), lambda i: (0, 0)),      # bias: resident
            pl.BlockSpec((TN, 1), lambda i: (i, 0)),     # labels: streamed
        ],
        out_specs=pl.BlockSpec((1, 3, L), lambda i: (i, 0, 0)),   # one lane-dense block/tile
        out_shape=jax.ShapeDtypeStruct((num_tiles, 3, L), jnp.float32),
        compiler_params=pltpu.CompilerParams(
            dimension_semantics=("parallel",),     # independent tiles -> megacore sharding
            vmem_limit_bytes=vmem_limit,
        ),
    )(feature, weight_t, bias2d, labels2d)

    # Tiny final reduction over tiles in the wrapper.
    part = jnp.sum(part, axis=0)                 # [3, L]
    correct = part[0, :C]
    total = part[1, :C]
    loss_sum = part[2, 0]
    n_valid = part[2, 1]
    acc_sum = part[2, 2]

    # NOTE: like torch CrossEntropyLoss(ignore_index=-1), loss is NaN when no label is valid.
    loss = loss_sum / n_valid
    acc = acc_sum / (n_valid + 1e-10)
    cat = jnp.stack([correct, total], axis=0)    # [2, C]
    return loss, acc, cat


def _reference(feature, weight, bias, labels):
    logits = feature @ weight.T + bias
    N, C = logits.shape
    valid = labels >= 0
    lse = jax.scipy.special.logsumexp(logits, axis=1)
    safe_labels = jnp.where(valid, labels, 0)
    logit_at = logits[jnp.arange(N), safe_labels]
    loss = jnp.sum(jnp.where(valid, lse - logit_at, 0.0)) / jnp.sum(valid)
    preds = jnp.argmax(logits, axis=1)
    acc = jnp.sum(valid & (preds == labels)) / (jnp.sum(valid) + 1e-10)
    adj = jnp.where(labels < 0, labels + C, labels)
    oh = jax.nn.one_hot(adj, C)
    total = jnp.sum(oh, axis=0)
    correct = jnp.sum(oh * (preds == labels)[:, None].astype(jnp.float32), axis=0)
    return loss, acc, jnp.stack([correct, total], axis=0)


if __name__ == "__main__":
    # args: feat_dim=4, crop_width=4, crop_height=4 -> D=64; num_base_class=8; batch N=13
    # (non-multiple of the tile size to exercise the in-kernel ragged-tile masking).
    N, feat_dim, crop_w, crop_h, num_class = 13, 4, 4, 4, 8
    D = feat_dim * crop_w * crop_h

    key = jax.random.PRNGKey(0)
    k_feat, k_w, k_b, k_lbl = jax.random.split(key, 4)

    feature = jax.random.normal(k_feat, (N, D), dtype=jnp.float32)
    bound = 1.0 / (D ** 0.5)   # nn.Linear default uniform init
    weight = jax.random.uniform(k_w, (num_class, D), minval=-bound, maxval=bound,
                                dtype=jnp.float32)
    bias = jax.random.uniform(k_b, (num_class,), minval=-bound, maxval=bound,
                              dtype=jnp.float32)
    labels = jax.random.randint(k_lbl, (N,), 0, num_class, dtype=jnp.int32)
    # Exercise ignore_index=-1 handling on one row.
    labels = labels.at[3].set(-1)

    # tile_n=8 -> 2 grid tiles, second one ragged (rows 8..12 real, 13..15 masked).
    loss, acc, cat = classifier_forward(feature, weight, bias, labels, tile_n=8)
    jax.block_until_ready((loss, acc, cat))

    ref_loss, ref_acc, ref_cat = _reference(feature, weight, bias, labels)
    assert jnp.allclose(loss, ref_loss, rtol=1e-4, atol=1e-4)
    assert jnp.allclose(acc, ref_acc, rtol=1e-4, atol=1e-4)
    assert jnp.allclose(cat, ref_cat, rtol=1e-4, atol=1e-4)

    print("KERNEL_OK")
</pallas_src>

<mosaic_0001>
module attributes {stable_mosaic.version = 11 : i64} {
  func.func @_classifier_kernel(%arg0: i32, %arg1: memref<8x64xf32, #tpu.memory_space<vmem>>, %arg2: memref<64x8xf32, #tpu.memory_space<vmem>>, %arg3: memref<1x8xf32, #tpu.memory_space<vmem>>, %arg4: memref<8x1xi32, #tpu.memory_space<vmem>>, %arg5: memref<1x3x128xf32, #tpu.memory_space<vmem>>) attributes {dimension_semantics = [#tpu.dimension_semantics<parallel>], iteration_bounds = array<i64: 2>, scalar_prefetch = 0 : i64, scratch_operands = 0 : i64, tpu.core_type = #tpu.core_type<tc>, window_params = [{transform_indices = @transform_0, window_bounds = array<i64: 8, 64>}, {pipeline_mode = #tpu.pipeline_mode<synchronous>, transform_indices = @transform_1, window_bounds = array<i64: 64, 8>}, {pipeline_mode = #tpu.pipeline_mode<synchronous>, transform_indices = @transform_2, window_bounds = array<i64: 1, 8>}, {transform_indices = @transform_3, window_bounds = array<i64: 8, 1>}, {transform_indices = @transform_4, window_bounds = array<i64: 1, 3, 128>}]} {
    %c0 = arith.constant 0 : index
    %c0_0 = arith.constant 0 : index
    %0 = vector.load %arg1[%c0, %c0_0] : memref<8x64xf32, #tpu.memory_space<vmem>>, vector<8x64xf32>
    %c0_1 = arith.constant 0 : index
    %c0_2 = arith.constant 0 : index
    %1 = vector.load %arg2[%c0_1, %c0_2] : memref<64x8xf32, #tpu.memory_space<vmem>>, vector<64x8xf32>
    %c0_3 = arith.constant 0 : index
    %c0_4 = arith.constant 0 : index
    %2 = vector.load %arg3[%c0_3, %c0_4] : memref<1x8xf32, #tpu.memory_space<vmem>>, vector<1x8xf32>
    %c0_5 = arith.constant 0 : index
    %c0_6 = arith.constant 0 : index
    %3 = vector.load %arg4[%c0_5, %c0_6] : memref<8x1xi32, #tpu.memory_space<vmem>>, vector<8x1xi32>
    %cst = arith.constant dense<0.000000e+00> : vector<8x8xf32>
    %4 = tpu.matmul %0, %1, %cst {dimension_numbers = #tpu.dot_dimension_numbers<[1], [0], [0], [1], [0, 0, 1, 1], [], []>} : vector<8x64xf32>, vector<64x8xf32>, vector<8x8xf32> -> vector<8x8xf32>
    %5 = vector.broadcast %2 : vector<1x8xf32> to vector<8x8xf32>
    %6 = arith.addf %4, %5 : vector<8x8xf32>
    %7 = tpu.iota {dimensions = array<i32: 0>} : vector<8x1xi32>
    %c8_i32 = arith.constant 8 : i32
    %8 = arith.muli %arg0, %c8_i32 : i32
    %9 = vector.broadcast %8 : i32 to vector<8x1xi32>
    %10 = arith.addi %9, %7 : vector<8x1xi32>
    %c13_i32 = arith.constant 13 : i32
    %11 = vector.broadcast %c13_i32 : i32 to vector<8x1xi32>
    %12 = arith.cmpi slt, %10, %11 : vector<8x1xi32>
    %c0_i32 = arith.constant 0 : i32
    %13 = vector.broadcast %c0_i32 : i32 to vector<8x1xi32>
    %14 = arith.cmpi sge, %3, %13 : vector<8x1xi32>
    %15 = arith.andi %14, %12 : vector<8x1xi1>
    %16 = tpu.iota {dimensions = array<i32: 1>} : vector<8x8xi32>
    %c0_i32_7 = arith.constant 0 : i32
    %17 = vector.broadcast %c0_i32_7 : i32 to vector<8x1xi32>
    %18 = arith.cmpi slt, %3, %17 : vector<8x1xi32>
    %c8_i32_8 = arith.constant 8 : i32
    %19 = vector.broadcast %c8_i32_8 : i32 to vector<8x1xi32>
    %20 = arith.addi %3, %19 : vector<8x1xi32>
    %21 = arith.select %18, %20, %3 : vector<8x1xi1>, vector<8x1xi32>
    %cst_9 = arith.constant dense<0xFF800000> : vector<8xf32>
    %22 = vector.multi_reduction <maximumf>, %6, %cst_9 [1] : vector<8x8xf32> to vector<8xf32>
    %23 = vector.shape_cast %22 : vector<8xf32> to vector<8x1xf32>
    %24 = vector.broadcast %23 : vector<8x1xf32> to vector<8x8xf32>
    %25 = arith.subf %6, %24 : vector<8x8xf32>
    %26 = math.exp %25 : vector<8x8xf32>
    %cst_10 = arith.constant dense<0.000000e+00> : vector<8xf32>
    %27 = vector.multi_reduction <add>, %26, %cst_10 [1] : vector<8x8xf32> to vector<8xf32>
    %28 = vector.shape_cast %27 : vector<8xf32> to vector<8x1xf32>
    %29 = math.log %28 : vector<8x1xf32>
    %30 = arith.addf %23, %29 : vector<8x1xf32>
    %31 = vector.broadcast %21 : vector<8x1xi32> to vector<8x8xi32>
    %32 = arith.cmpi eq, %16, %31 : vector<8x8xi32>
    %cst_11 = arith.constant 0.000000e+00 : f32
    %33 = vector.broadcast %cst_11 : f32 to vector<8x8xf32>
    %34 = arith.select %32, %6, %33 : vector<8x8xi1>, vector<8x8xf32>
    %cst_12 = arith.constant dense<0.000000e+00> : vector<8xf32>
    %35 = vector.multi_reduction <add>, %34, %cst_12 [1] : vector<8x8xf32> to vector<8xf32>
    %36 = vector.shape_cast %35 : vector<8xf32> to vector<8x1xf32>
    %37 = arith.subf %30, %36 : vector<8x1xf32>
    %cst_13 = arith.constant 0.000000e+00 : f32
    %38 = vector.broadcast %cst_13 : f32 to vector<8x1xf32>
    %39 = arith.select %15, %37, %38 : vector<8x1xi1>, vector<8x1xf32>
    %40 = vector.broadcast %23 : vector<8x1xf32> to vector<8x8xf32>
    %41 = arith.cmpf oeq, %6, %40 : vector<8x8xf32>
    %c8_i32_14 = arith.constant 8 : i32
    %42 = vector.broadcast %c8_i32_14 : i32 to vector<8x8xi32>
    %43 = arith.select %41, %16, %42 : vector<8x8xi1>, vector<8x8xi32>
    %cst_15 = arith.constant dense<2147483647> : vector<8xi32>
    %44 = vector.multi_reduction <minsi>, %43, %cst_15 [1] : vector<8x8xi32> to vector<8xi32>
    %45 = vector.shape_cast %44 : vector<8xi32> to vector<8x1xi32>
    %46 = arith.cmpi eq, %45, %3 : vector<8x1xi32>
    %47 = vector.shape_cast %39 : vector<8x1xf32> to vector<1x8x1xf32>
    %cst_16 = arith.constant dense<0.000000e+00> : vector<1xf32>
    %48 = vector.multi_reduction <add>, %47, %cst_16 [1, 2] : vector<1x8x1xf32> to vector<1xf32>
    %49 = vector.shape_cast %48 : vector<1xf32> to vector<1x1x1xf32>
    %50 = vector.extract %49[0, 0, 0] : f32 from vector<1x1x1xf32>
    %cst_17 = arith.constant 1.000000e+00 : f32
    %cst_18 = arith.constant 0.000000e+00 : f32
    %51 = vector.broadcast %cst_17 : f32 to vector<8x1xf32>
    %52 = vector.broadcast %cst_18 : f32 to vector<8x1xf32>
    %53 = arith.select %15, %51, %52 : vector<8x1xi1>, vector<8x1xf32>
    %54 = vector.shape_cast %53 : vector<8x1xf32> to vector<1x8x1xf32>
    %cst_19 = arith.constant dense<0.000000e+00> : vector<1xf32>
    %55 = vector.multi_reduction <add>, %54, %cst_19 [1, 2] : vector<1x8x1xf32> to vector<1xf32>
    %56 = vector.shape_cast %55 : vector<1xf32> to vector<1x1x1xf32>
    %57 = vector.extract %56[0, 0, 0] : f32 from vector<1x1x1xf32>
    %58 = arith.andi %15, %46 : vector<8x1xi1>
    %cst_20 = arith.constant 1.000000e+00 : f32
    %cst_21 = arith.constant 0.000000e+00 : f32
    %59 = vector.broadcast %cst_20 : f32 to vector<8x1xf32>
    %60 = vector.broadcast %cst_21 : f32 to vector<8x1xf32>
    %61 = arith.select %58, %59, %60 : vector<8x1xi1>, vector<8x1xf32>
    %62 = vector.shape_cast %61 : vector<8x1xf32> to vector<1x8x1xf32>
    %cst_22 = arith.constant dense<0.000000e+00> : vector<1xf32>
    %63 = vector.multi_reduction <add>, %62, %cst_22 [1, 2] : vector<1x8x1xf32> to vector<1xf32>
    %64 = vector.shape_cast %63 : vector<1xf32> to vector<1x1x1xf32>
    %65 = vector.extract %64[0, 0, 0] : f32 from vector<1x1x1xf32>
    %66 = tpu.iota {dimensions = array<i32: 1>} : vector<8x128xi32>
    %67 = vector.broadcast %21 : vector<8x1xi32> to vector<8x128xi32>
    %68 = arith.cmpi eq, %66, %67 : vector<8x128xi32>
    %69 = vector.broadcast %12 : vector<8x1xi1> to vector<8x128xi1>
    %70 = arith.andi %68, %69 : vector<8x128xi1>
    %71 = arith.extui %70 : vector<8x128xi1> to vector<8x128xi32>
    %72 = arith.sitofp %71 : vector<8x128xi32> to vector<8x128xf32>
    %cst_23 = arith.constant dense<0.000000e+00> : vector<128xf32>
    %73 = vector.multi_reduction <add>, %72, %cst_23 [0] : vector<8x128xf32> to vector<128xf32>
    %74 = vector.shape_cast %73 : vector<128xf32> to vector<1x128xf32>
    %cst_24 = arith.constant 0.000000e+00 : f32
    %75 = vector.shape_cast %46 : vector<8x1xi1> to vector<8x1xi1>
    %76 = vector.broadcast %75 : vector<8x1xi1> to vector<8x128xi1>
    %77 = vector.broadcast %cst_24 : f32 to vector<8x128xf32>
    %78 = arith.select %76, %72, %77 : vector<8x128xi1>, vector<8x128xf32>
    %cst_25 = arith.constant dense<0.000000e+00> : vector<128xf32>
    %79 = vector.multi_reduction <add>, %78, %cst_25 [0] : vector<8x128xf32> to vector<128xf32>
    %80 = vector.shape_cast %79 : vector<128xf32> to vector<1x128xf32>
    %81 = tpu.iota {dimensions = array<i32: 1>} : vector<1x128xi32>
    %c0_i32_26 = arith.constant 0 : i32
    %82 = vector.broadcast %c0_i32_26 : i32 to vector<1x128xi32>
    %83 = arith.cmpi eq, %81, %82 : vector<1x128xi32>
    %cst_27 = arith.constant 0.000000e+00 : f32
    %84 = vector.broadcast %50 : f32 to vector<1x128xf32>
    %85 = vector.broadcast %cst_27 : f32 to vector<1x128xf32>
    %86 = arith.select %83, %84, %85 : vector<1x128xi1>, vector<1x128xf32>
    %c1_i32 = arith.constant 1 : i32
    %87 = vector.broadcast %c1_i32 : i32 to vector<1x128xi32>
    %88 = arith.cmpi eq, %81, %87 : vector<1x128xi32>
    %cst_28 = arith.constant 0.000000e+00 : f32
    %89 = vector.broadcast %57 : f32 to vector<1x128xf32>
    %90 = vector.broadcast %cst_28 : f32 to vector<1x128xf32>
    %91 = arith.select %88, %89, %90 : vector<1x128xi1>, vector<1x128xf32>
    %92 = arith.addf %86, %91 : vector<1x128xf32>
    %c2_i32 = arith.constant 2 : i32
    %93 = vector.broadcast %c2_i32 : i32 to vector<1x128xi32>
    %94 = arith.cmpi eq, %81, %93 : vector<1x128xi32>
    %cst_29 = arith.constant 0.000000e+00 : f32
    %95 = vector.broadcast %65 : f32 to vector<1x128xf32>
    %96 = vector.broadcast %cst_29 : f32 to vector<1x128xf32>
    %97 = arith.select %94, %95, %96 : vector<1x128xi1>, vector<1x128xf32>
    %98 = arith.addf %92, %97 : vector<1x128xf32>
    %99 = tpu.iota {dimensions = array<i32: 0>} : vector<3x128xi32>
    %c0_i32_30 = arith.constant 0 : i32
    %100 = vector.broadcast %c0_i32_30 : i32 to vector<3x128xi32>
    %101 = arith.cmpi eq, %99, %100 : vector<3x128xi32>
    %c1_i32_31 = arith.constant 1 : i32
    %102 = vector.broadcast %c1_i32_31 : i32 to vector<3x128xi32>
    %103 = arith.cmpi eq, %99, %102 : vector<3x128xi32>
    %104 = vector.shape_cast %74 : vector<1x128xf32> to vector<1x128xf32>
    %105 = vector.broadcast %104 : vector<1x128xf32> to vector<3x128xf32>
    %106 = vector.shape_cast %98 : vector<1x128xf32> to vector<1x128xf32>
    %107 = vector.broadcast %106 : vector<1x128xf32> to vector<3x128xf32>
    %108 = arith.select %103, %105, %107 : vector<3x128xi1>, vector<3x128xf32>
    %109 = vector.shape_cast %80 : vector<1x128xf32> to vector<1x128xf32>
    %110 = vector.broadcast %109 : vector<1x128xf32> to vector<3x128xf32>
    %111 = arith.select %101, %110, %108 : vector<3x128xi1>, vector<3x128xf32>
    %112 = vector.shape_cast %111 : vector<3x128xf32> to vector<1x3x128xf32>
    %c0_32 = arith.constant 0 : index
    %c0_33 = arith.constant 0 : index
    %c0_34 = arith.constant 0 : index
    %113 = vector.load %arg5[%c0_32, %c0_33, %c0_34] : memref<1x3x128xf32, #tpu.memory_space<vmem>>, vector<1x3x128xf32>
    tpu.vector_store %arg5[%c0_32, %c0_33, %c0_34], %112 {strides = array<i32>} : memref<1x3x128xf32, #tpu.memory_space<vmem>>, vector<1x3x128xf32>,
    return
  }
  func.func @transform_0(%arg0: i32) -> (i32, i32) {
    %c0_i32 = arith.constant 0 : i32
    %c0_i32_0 = arith.constant 0 : i32
    return %arg0, %c0_i32 : i32, i32
  }
  func.func @transform_1(%arg0: i32) -> (i32, i32) {
    %c0_i32 = arith.constant 0 : i32
    %c0_i32_0 = arith.constant 0 : i32
    %c0_i32_1 = arith.constant 0 : i32
    return %c0_i32, %c0_i32_0 : i32, i32
  }
  func.func @transform_2(%arg0: i32) -> (i32, i32) {
    %c0_i32 = arith.constant 0 : i32
    %c0_i32_0 = arith.constant 0 : i32
    %c0_i32_1 = arith.constant 0 : i32
    return %c0_i32, %c0_i32_0 : i32, i32
  }
  func.func @transform_3(%arg0: i32) -> (i32, i32) {
    %c0_i32 = arith.constant 0 : i32
    %c0_i32_0 = arith.constant 0 : i32
    return %arg0, %c0_i32 : i32, i32
  }
  func.func @transform_4(%arg0: i32) -> (i32, i32, i32) {
    %c0_i32 = arith.constant 0 : i32
    %c0_i32_0 = arith.constant 0 : i32
    %c0_i32_1 = arith.constant 0 : i32
    return %arg0, %c0_i32, %c0_i32_0 : i32, i32, i32
  }
}

</mosaic_0001>

<bundles_post_ra>
// kernel: tpu_custom_call.1
= control target key start
LH: loop header
LB: loop body
LE: loop exit
PB: predicated region body
PF: predicated region fallthrough
CT: control target
= control target key end

     0   :  { %s608_s15 = smov 0   ;;  %s723_s0 = inlined_call_operand.vmem [shape: f32[13,64], index: 0, kind: input, shape index: {}]   ;;  %s724_s1 = inlined_call_operand.vmem [shape: f32[64,8], index: 1, kind: input, shape index: {}]   ;;  %s725_s2 = inlined_call_operand.vmem [shape: f32[1,8], index: 2, kind: input, shape index: {}]   ;;  %s726_s3 = inlined_call_operand.vmem [shape: s32[13,1], index: 3, kind: input, shape index: {}]   ;;  %s727_s4 = inlined_call_operand.vmem [shape: f32[2,3,128], index: 4, kind: output, shape index: {}]  }
   0x1 LB: > { %s614_s16 = sadd.s32 4294967295, %s577_s15   ;;  %p497_p0 = scmp.ge.s32.totalorder %s577_s15, 1  ;;  %s577_s15 = sphi %s608_s15, %s14_s15  }
   0x2   : > { %p170_p1 = scmp.lt.s32.totalorder %s577_s15, 3 }
   0x4   : > { %p171_p2 = pnand %p497_p0, %p170_p1 }
   0x5   : > { %v211_v0 = vld [vmem:[%s724_s1] sm:$0xff] (!%p171_p2)  ;;  %v212_v1 = vld [vmem:[%s724_s1 + $0x8] sm:$0xff] (!%p171_p2)  ;;  %v213_v2 = vld [vmem:[%s724_s1 + $0x10] sm:$0xff] (!%p171_p2)  ;;  %v579_v3 = vmov (!%p171_p2), 0.0|0.0   ;;  %vm580_vm0 = vmmov (!%p171_p2), 0   ;;  %v581_v6 = vmov (!%p171_p2), 0.0   ;;  %v301_v24 = vlaneseq (!%p171_p2) }
   0x6   : > { %174 = sbr.rel (%p171_p2) target bundleno = 896 (0x380), region = 36  ;;  %535 = vmatprep.subr.bf16.mxu0 (!%p171_p2), %v579_v3  ;;  %v536_v4 = vpack.c.bf16 (!%p171_p2), %v212_v1, %v211_v0  ;;  %v214_v5 = vld [vmem:[%s724_s1 + $0x18] sm:$0xff] (!%p171_p2)  ;;  %532 = vmatprep.mubr.msk.f32.mxu0 (!%p171_p2), %vm580_vm0, %v581_v6  ;;  %p198_p3 = scmp.lt.s32.totalorder (!%p171_p2), %s614_s16, 1  ;;  %v582_v7 = vmov (!%p171_p2), 0   ;;  %v215_v9 = vld [vmem:[%s724_s1 + $0x20] sm:$0xff] (!%p171_p2)  ;;  %v216_v10 = vld [vmem:[%s724_s1 + $0x28] sm:$0xff] (!%p171_p2) }
   0x7   : > { %565 = vset.pattern.permute.xlu1 (!%p171_p2), %v582_v7  ;;  %566 = vset.pattern.permute.xlu0 (!%p171_p2), %v582_v7  ;;  %v539_v8 = vpack.c.bf16 (!%p171_p2), %v214_v5, %v213_v2  ;;  %v542_v11 = vpack.c.bf16 (!%p171_p2), %v216_v10, %v215_v9  ;;  %v217_v13 = vld [vmem:[%s724_s1 + $0x30] sm:$0xff] (!%p171_p2)  ;;  %v218_v14 = vld [vmem:[%s724_s1 + $0x38] sm:$0xff] (!%p171_p2)  ;;  %vm227_vm2 = vcmask (!%p171_p2), 523264   ;;  %v501_v19 = vld [vmem:[%s725_s2] ss:$0 sm:$0xff] (!%p171_p2)  ;;  %vm314_vm3 = vcmask (!%p171_p2), 64512  }
   0x8   : > { %537 = vmatpush3.bf16.msra.mxu0 (!%p171_p2), %v536_v4  ;;  %v545_v17 = vpack.c.bf16 (!%p171_p2), %v218_v14, %v217_v13  ;;  %v665_v25 = vand.u32 (!%p171_p2), 127, %v301_v24  ;;  %s503_s19 = sshll.u32 (!%p171_p2), %s614_s16, 3  ;;  %v671_v35 = vshrl.u32 (!%p171_p2), %v301_v24, 7  ;;  %vm355_vm10 = vcmask (!%p171_p2), 7168  }
   0x9   : > { %538 = vmatprep.subr.bf16.mxu0 (!%p171_p2), %v579_v3  ;;  %v304_v36 = vstv (!%p171_p2), %s503_s19 }
   0xa   : > { %v674_v38 = vadd.s32 (!%p171_p2), %v304_v36, %v671_v35  ;;  %vm412_vm15 = vcmp.eq.s32.totalorder (!%p171_p2), %v665_v25, 0  ;;  %vm415_vm0 = vcmp.eq.s32.totalorder (!%p171_p2), %v665_v25, 1 }
   0xc   : > { %540 = vmatpush3.bf16.msra.mxu0 (!%p171_p2), %v539_v8  ;;  %vm306_vm7 = vcmp.lt.s32.totalorder (!%p171_p2), %v674_v38, 13 }
   0xd   : > { %s635_s25 = scalar_select %p198_p3, %s614_s16, 1  ;;  %541 = vmatprep.subr.bf16.mxu0 %v579_v3 }
   0xf   : > { %s498_s30 = sshll.u32 %s635_s25, 3  ;;  %s500_s22 = sshll.u32 %s635_s25, 2 }
  0x10   : > { %s205_s7 = scalar_lea.vmem %s726_s3, %s498_s30  ;;  %543 = vmatpush3.bf16.msra.mxu0 %v542_v11  ;;  %s201_s14 = scalar_lea.vmem %s723_s0, %s498_s30 }
  0x11   : > { %v647_v12 = vld [vmem:[%s205_s7] sm:$0xff]  ;;  %544 = vmatprep.subr.bf16.mxu0 %v579_v3  ;;  %s209_s26 = scalar_lea.vmem %s727_s4, %s500_s22 }
  0x12   : > { %vm311_vm1 = vcmp.lt.s32.totalorder %v647_v12, 0  ;;  %v312_v15 = vadd.s32 8, %v647_v12  ;;  %v210_v18 = vld [vmem:[%s201_s14] sm:$0xff]  ;;  %vm307_vm5 = vcmp.ge.s32.totalorder %v647_v12, 0 }
  0x13   : > { %vm684_vm9 = vmand %vm307_vm5, %vm306_vm7 }
  0x14   : > { %v313_v16 = vsel %vm311_vm1, %v312_v15, %v647_v12  ;;  %546 = vmatpush3.bf16.msra.mxu0 %v545_v17  ;;  %v366_v45 = vsel %vm684_vm9, 1.0, %v581_v6  ;;  %vm419_vm1 = vcmp.eq.s32.totalorder %v665_v25, 2 }
  0x15   : > { %328 = vperm.xlu1 %565, %v313_v16   ;;  %v367_v47 = vsel %vm355_vm10, %v366_v45, 0.0 }
  0x17   : > { %533 = vmatmul.mubr.msk.f32.vlgmr.msra.gmra.mrb[0].mxu0 %vm227_vm2, %v210_v18  ;;  %vm424_vm2 = vcmp.eq.s32.totalorder %v671_v35, 1 }
  0x94   : > { %v676_v39 = vpop.permute.xlu1 %328 }
  0x95   : > { %vm330_vm6 = vcmp.eq.s32.totalorder %v665_v25, %v676_v39 }
  0x96   : > { %vm391_vm13 = vmand %vm330_vm6, %vm306_vm7 }
  0xea   : > { %v297_v20 = vpop.f32.mrb[0].mxu0 }
  0xeb   : > { %v298_v21 = vadd.f32 %v501_v19, %v297_v20  ;;  %v534_v22 = vpop.f32.mrb[1].mxu0 }
  0xed   : > { %v315_v23 = vsel %vm314_vm3, %v298_v21, -inf  ;;  %v331_v44 = vsel %vm330_vm6, %v298_v21, 0.0 }
  0xee   : > { %316 = vmax.xlane.f32.xlu0 %v315_v23  ;;  %v332_v46 = vsel %vm314_vm3, %v331_v44, 0.0  ;;  %v504_v23 = vsel %vm391_vm13, 1.0, %v581_v6 }
 0x17b   : > { %v317_v26 = vpop.xlane.xlu0 %316 }
 0x17c   : > { %v318_v27 = vsub.f32 %v298_v21, %v317_v26  ;;  %vm337_vm4 = vcmp.eq.f32.partialorder %v298_v21, %v317_v26 }
 0x17d   : > { %v338_v28 = vsel %vm337_vm4, %v665_v25, 8 }
 0x17e   : > { %v319_v29 = vmul.f32 1.442695, %v318_v27  ;;  %v339_v30 = vsel %vm314_vm3, %v338_v28, 2147483647 }
 0x17f   : > { %v341_v31 = vshra.s32 %v339_v30, 16  ;;  %v340_v37 = vand.u32 65535, %v339_v30 }
 0x180   : > { %567 = vpow2.f32 %v319_v29 }
 0x181   : > { %v343_v32 = vcvt.s32.f32 %v341_v31  ;;  %v342_v41 = vcvt.s32.f32 %v340_v37 }
 0x183   : > { %344 = vmin.xlane.f32.xlu0 %v343_v32 }
 0x18a   : > { %v568_v33 = vpop.eup %567 }
 0x18b   : > { %v321_v34 = vsel %vm314_vm3, %v568_v33, 0.0  ;;  %vm423_vm3 = vcmp.eq.s32.totalorder %v671_v35, 0 }
 0x18c   : > { %322 = vadd.xlane.f32.xlu1 %v321_v34 }
 0x210   : > { %v345_v40 = vpop.xlane.xlu0 %344 }
 0x211   : > { %vm346_vm8 = vcmp.eq.f32.partialorder %v343_v32, %v345_v40  ;;  %v351_v50 = vcvt.f32.s32 %v345_v40 }
 0x212   : > { %v347_v43 = vsel %vm346_vm8, %v342_v41, inf }
 0x213   : > { %348 = vmin.xlane.f32.xlu0 %v347_v43  ;;  %v352_v53 = vshll.u32 %v351_v50, 16 }
 0x217   : > { %333 = vadd.xlane.f32.xlu0 %v332_v46 }
 0x219   : > { %v323_v48 = vpop.xlane.xlu1 %322 }
 0x21a   : > { %569 = vlog2.f32 %v323_v48 }
 0x21b   : > { %368 = vadd.xlane.f32.xlu0 %v367_v47 }
 0x224   : > { %v570_v49 = vpop.eup %569 }
 0x225   : > { %v325_v51 = vmul.f32 0.6931472, %v570_v49 }
 0x227   : > { %v326_v56 = vadd.f32 %v325_v51, %v317_v26  ;;  %v394_v26 = vrot.slane %v504_v23, 4 }
 0x229   : > { %v395_v28 = vadd.f32 %v504_v23, %v394_v26 }
 0x22b   : > { %v396_v30 = vrot.slane %v395_v28, 2 }
 0x22d   : > { %v397_v32 = vadd.f32 %v396_v30, %v395_v28 }
 0x2a0   : > { %v349_v52 = vpop.xlane.xlu0 %348 }
 0x2a1   : > { %v350_v54 = vcvt.f32.s32 %v349_v52 }
 0x2a3   : > { %v353_v55 = vadd.s32 %v352_v53, %v350_v54 }
 0x2a4   : > { %v334_v57 = vpop.xlane.xlu0 %333 }
 0x2a5   : > { %v335_v58 = vsub.f32 %v326_v56, %v334_v57  ;;  %vm354_vm11 = vcmp.eq.s32.totalorder %v353_v55, %v647_v12 }
 0x2a6   : > { %vm377_vm12 = vmand %vm684_vm9, %vm354_vm11  ;;  %v400_v63 = vsel %vm354_vm11, 1, %v582_v7 }
 0x2a7   : > { %v336_v59 = vsel %vm684_vm9, %v335_v58, 0.0  ;;  %v378_v61 = vsel %vm377_vm12, 1.0, %v581_v6  ;;  %v398_v6 = vrot.slane %v397_v32, 1 }
 0x2a8   : > { %v356_v60 = vsel %vm355_vm10, %v336_v59, 0.0  ;;  %v379_v62 = vsel %vm355_vm10, %v378_v61, 0.0  ;;  %v369_v0 = vpop.xlane.xlu0 %368 }
 0x2a9   : > { %357 = vadd.xlane.f32.xlu0 %v356_v60  ;;  %v370_v1 = vrot.slane %v369_v0, 4  ;;  %v399_v43 = vadd.f32 %v398_v6, %v397_v32 }
 0x2ab   : > { %v371_v2 = vadd.f32 %v370_v1, %v369_v0 }
 0x2ad   : > { %380 = vadd.xlane.f32.xlu0 %v379_v62  ;;  %v372_v3 = vrot.slane %v371_v2, 2 }
 0x2af   : > { %v373_v10 = vadd.f32 %v372_v3, %v371_v2 }
 0x2b1   : > { %v374_v15 = vrot.slane %v373_v10, 1 }
 0x2b3   : > { %v375_v7 = vadd.f32 %v374_v15, %v373_v10 }
 0x2c3   : > { %402 = vperm.xlu0 %566, %v400_v63  }
 0x336   : > { %v358_v4 = vpop.xlane.xlu0 %357 }
 0x337   : > { %v359_v5 = vrot.slane %v358_v4, 4 }
 0x339   : > { %v360_v8 = vadd.f32 %v359_v5, %v358_v4 }
 0x33a   : > { %v381_v9 = vpop.xlane.xlu0 %380 }
 0x33b   : > { %v361_v11 = vrot.slane %v360_v8, 2  ;;  %v382_v12 = vrot.slane %v381_v9, 4 }
 0x33d   : > { %v383_v13 = vadd.f32 %v382_v12, %v381_v9  ;;  %v362_v14 = vadd.f32 %v361_v11, %v360_v8 }
 0x33f   : > { %v384_v16 = vrot.slane %v383_v13, 2  ;;  %v363_v17 = vrot.slane %v362_v14, 1 }
 0x341   : > { %v364_v18 = vadd.f32 %v363_v17, %v362_v14  ;;  %v385_v19 = vadd.f32 %v384_v16, %v383_v13 }
 0x342   : > { %v403_v22 = vpop.permute.xlu0 %402 }
 0x343   : > { %547 = vpush %v364_v18  ;;  %v386_v20 = vrot.slane %v385_v19, 1  ;;  %vm404_vm14 = vcmp.eq.s32.totalorder %v403_v22, 1 }
 0x344   : > { %549 = vpush %v375_v7  ;;  %v405_v24 = vsel %vm404_vm14, %v504_v23, 0.0 }
 0x345   : > { %v387_v21 = vadd.f32 %v386_v20, %v385_v19  ;;  %v406_v27 = vrot.slane %v405_v24, 4 }
 0x347   : > { %551 = vpush %v387_v21  ;;  %v407_v29 = vadd.f32 %v406_v27, %v405_v24 }
 0x349   : > { %v408_v31 = vrot.slane %v407_v29, 2 }
 0x34b   : > { %v409_v33 = vadd.f32 %v408_v31, %v407_v29 }
 0x34d   : > { %v410_v39 = vrot.slane %v409_v33, 1 }
 0x34f   : > { %v411_v45 = vadd.f32 %v410_v39, %v409_v33 }
 0x374   : > { %s548_s16 = spop %547 }
 0x375   : > { %v413_v34 = vstv %s548_s16  ;;  %s550_s20 = spop %549 }
 0x376   : > { %v414_v36 = vsel %vm412_vm15, %v413_v34, 0.0  ;;  %v416_v37 = vstv %s550_s20 }
 0x377   : > { %v417_v38 = vsel %vm415_vm0, %v416_v37, 0.0 }
 0x378   : > { %s552_s21 = spop %551  ;;  %v418_v40 = vadd.f32 %v417_v38, %v414_v36 }
 0x379   : > { %v420_v41 = vstv %s552_s21 }
 0x37a   : > { %v421_v42 = vsel %vm419_vm1, %v420_v41, 0.0 }
 0x37b   : > { %v422_v44 = vadd.f32 %v421_v42, %v418_v40 }
 0x37d   : > { %v425_v46 = vsel %vm424_vm2, %v399_v43, %v422_v44 }
 0x37e   : > { %v426_v47 = vsel %vm423_vm3, %v411_v45, %v425_v46 }
 0x37f   : > { %427 = vst [vmem:[%s209_s26] sm:$0x7] %v426_v47 }
 0x380 PF: > { %s14_s15 = sadd.s32 1, %s577_s15  }
 0x381   : > { %p11_p4 = scmp.ge.s32.totalorder %s14_s15, 4  }
 0x383   :  { %13 = sbr.rel (!%p11_p4) target bundleno = 1 (0x1), region = 69 }

</bundles_post_ra>
